<compile_context>
chip_gen: v7x
topology: tpu7x:2x2x1
jax: 0.10.0
libtpu: 0.0.40
codegen_flags: <defaults>
</compile_context>

<pallas_src>
import functools
import math

import jax
import jax.numpy as jnp
from jax import lax
from jax.experimental import pallas as pl
from jax.experimental.pallas import tpu as pltpu

NEG_SLOPE = 0.01  # torch F.leaky_relu default negative_slope


def _round_up(x, m):
    return ((x + m - 1) // m) * m


def _cdiv(a, b):
    return -(-a // b)


def _gan_disc_kernel(bid_ref, valid_ref, x_ref, w1_ref, b1_ref, w2_ref,
                     b2_ref, w3_ref, b3_ref, out_ref):
    """One batch tile of one discriminator branch.

    grid = (total_tiles,) over the concatenation [real tiles | fake tiles].
    Scalar-prefetch tables give, per grid step, the branch id (selects the
    weight block) and the number of valid (non-padded) rows in this tile.

    Writes a lane-dense (8, 128) partial-sum block:
        row 0 (all lanes) = sum_i softplus( logit_i)   # BCE vs target 0
        row 1 (all lanes) = sum_i softplus(-logit_i)   # BCE vs target 1
    """
    i = pl.program_id(0)

    x = x_ref[...]  # (tile, dim_z) bf16 — streamed per grid step.

    # bf16 MXU matmuls with f32 accumulation; elementwise work stays f32.
    h1 = jnp.dot(x, w1_ref[...], preferred_element_type=jnp.float32) + b1_ref[...]
    h1 = jnp.maximum(h1, NEG_SLOPE * h1)                    # leaky_relu (1 vmax)

    h2 = jnp.dot(h1.astype(jnp.bfloat16), w2_ref[...],
                 preferred_element_type=jnp.float32) + b2_ref[...]
    h2 = jnp.maximum(h2, NEG_SLOPE * h2)

    # Final layer (out_features == 1): VPU multiply + lane reduction against
    # the [1, H] weight row instead of a padded MXU matmul.
    logits = jnp.sum(h2 * w3_ref[...], axis=-1, keepdims=True) + b3_ref[...]

    # Mask rows padded up to this branch's tile boundary.
    n_valid = valid_ref[i]
    row = lax.broadcasted_iota(jnp.int32, logits.shape, 0)
    mask = row < n_valid

    # Numerically stable BCE-with-logits (same formulation torch uses):
    #   softplus(x)  = max(x, 0) + log1p(exp(-|x|))   -> target 0
    #   softplus(-x) = softplus(x) - x                -> target 1
    sp = jnp.maximum(logits, 0.0) + jnp.log1p(jnp.exp(-jnp.abs(logits)))
    sp = jnp.where(mask, sp, 0.0)
    lg = jnp.where(mask, logits, 0.0)

    s0 = jnp.sum(sp)              # sum softplus( logits)
    s1 = s0 - jnp.sum(lg)         # sum softplus(-logits)

    sub = lax.broadcasted_iota(jnp.int32, (8, 128), 0)
    out_ref[...] = jnp.where(sub == 0, s0, jnp.where(sub == 1, s1, 0.0))


def pack_discriminator_params(params_real, params_fake):
    """One-time packing: stack branches, cast matmul weights to bf16 and
    zero-pad the hidden dim to a multiple of 128 (lane-dense intermediates).

    Each params_* is (w1, b1, w2, b2, w3, b3) with w: [in, out], b: [1, out].
    """
    w1r, b1r, w2r, b2r, w3r, b3r = params_real
    w1f, b1f, w2f, b2f, w3f, b3f = params_fake
    hidden = w1r.shape[1]
    hp = _round_up(hidden, 128)
    ph = hp - hidden

    def pad_cols(a):
        return jnp.pad(a, ((0, 0), (0, ph)))

    def pad_both(a):
        return jnp.pad(a, ((0, ph), (0, ph)))

    W1 = jnp.stack([pad_cols(w1r), pad_cols(w1f)]).astype(jnp.bfloat16)  # (2, dz, Hp)
    B1 = jnp.stack([pad_cols(b1r), pad_cols(b1f)]).astype(jnp.float32)   # (2, 1, Hp)
    W2 = jnp.stack([pad_both(w2r), pad_both(w2f)]).astype(jnp.bfloat16)  # (2, Hp, Hp)
    B2 = jnp.stack([pad_cols(b2r), pad_cols(b2f)]).astype(jnp.float32)   # (2, 1, Hp)
    W3 = jnp.stack([pad_cols(w3r.T), pad_cols(w3f.T)]).astype(jnp.float32)  # (2, 1, Hp)
    B3 = jnp.stack([b3r, b3f]).astype(jnp.float32).reshape(2, 1, 1)      # (2, 1, 1)
    return (W1, B1, W2, B2, W3, B3)


def gan_discriminator_bce_sums(z_real, z_fake, packed, *, max_tile=1024):
    """Single Pallas launch covering both discriminator branches.

    Returns ((s0_real, s1_real), (s0_fake, s1_fake)) where
      s0 = sum softplus( logits)   (BCE vs target 0)
      s1 = sum softplus(-logits)   (BCE vs target 1)
    """
    W1, B1, W2, B2, W3, B3 = packed
    dim_z, hp = W1.shape[1], W1.shape[2]
    n_real, n_fake = z_real.shape[0], z_fake.shape[0]
    assert z_real.shape[1] == dim_z and z_fake.shape[1] == dim_z

    # Balanced tile choice: multiple of 16 (bf16 sublane packing); multiple of
    # 128 (whole MXU M passes) once the batch is large.
    max_n = max(n_real, n_fake)
    if max_n <= max_tile:
        tile = _round_up(max_n, 16)
    else:
        nt = _cdiv(max_n, max_tile)
        tile = _round_up(_cdiv(max_n, nt), 128)

    tiles = (_cdiv(n_real, tile), _cdiv(n_fake, tile))
    total_tiles = tiles[0] + tiles[1]

    # Per-grid-step scalar tables: branch id (selects weight block) and the
    # number of valid rows in the tile (masks the partially padded last tile).
    branch_ids, valids = [], []
    for b, n in enumerate((n_real, n_fake)):
        for t in range(tiles[b]):
            branch_ids.append(b)
            valids.append(min(tile, n - t * tile))
    branch_ids = jnp.asarray(branch_ids, jnp.int32)
    valids = jnp.asarray(valids, jnp.int32)

    # Concatenated bf16 input; each branch padded only to its own tile boundary.
    def pad_rows(a, rows):
        return jnp.pad(a.astype(jnp.bfloat16), ((0, rows - a.shape[0]), (0, 0)))

    x = jnp.concatenate([pad_rows(z_real, tiles[0] * tile),
                         pad_rows(z_fake, tiles[1] * tile)], axis=0)

    grid_spec = pltpu.PrefetchScalarGridSpec(
        num_scalar_prefetch=2,             # branch_ids, valids -> SMEM
        grid=(total_tiles,),
        in_specs=[
            pl.BlockSpec((tile, dim_z), lambda i, bid, val: (i, 0)),
            pl.BlockSpec((None, dim_z, hp), lambda i, bid, val: (bid[i], 0, 0)),
            pl.BlockSpec((None, 1, hp), lambda i, bid, val: (bid[i], 0, 0)),
            pl.BlockSpec((None, hp, hp), lambda i, bid, val: (bid[i], 0, 0)),
            pl.BlockSpec((None, 1, hp), lambda i, bid, val: (bid[i], 0, 0)),
            pl.BlockSpec((None, 1, hp), lambda i, bid, val: (bid[i], 0, 0)),
            pl.BlockSpec((None, 1, 1), lambda i, bid, val: (bid[i], 0, 0)),
        ],
        out_specs=pl.BlockSpec((None, 8, 128), lambda i, bid, val: (i, 0, 0)),
    )

    rows = total_tiles * tile
    flops = 2 * rows * (dim_z * hp + hp * hp + hp)
    bytes_accessed = (x.size * 2 + W1.size * 2 + W2.size * 2
                      + (B1.size + B2.size + W3.size + B3.size) * 4
                      + total_tiles * 8 * 128 * 4)
    cost = pl.CostEstimate(flops=int(flops), transcendentals=int(2 * rows),
                           bytes_accessed=int(bytes_accessed))

    partial = pl.pallas_call(
        _gan_disc_kernel,
        out_shape=jax.ShapeDtypeStruct((total_tiles, 8, 128), jnp.float32),
        grid_spec=grid_spec,
        compiler_params=pltpu.CompilerParams(
            dimension_semantics=("parallel",),        # tiles split across TCs
            vmem_limit_bytes=48 * 1024 * 1024,
        ),
        cost_estimate=cost,
    )(branch_ids, valids, x, W1, B1, W2, B2, W3, B3)

    s0 = partial[:, 0, 0]
    s1 = partial[:, 1, 0]
    real = (jnp.sum(s0[:tiles[0]]), jnp.sum(s1[:tiles[0]]))
    fake = (jnp.sum(s0[tiles[0]:]), jnp.sum(s1[tiles[0]:]))
    return real, fake


def gan_forward(z, z_real, packed_params, with_G=True):
    """Mirrors GAN.forward: returns (D_loss, G_loss) (or D_loss if with_G=False).

    # TODO(synk): the torch module draws z_real = np.random.randn(dim_data, dim_z)
    # inside forward(); here it is a deterministic explicit input instead.
    """
    n_real = z_real.shape[0]
    n_fake = z.shape[0]

    (s0_real, s1_real), (s0_fake, s1_fake) = gan_discriminator_bce_sums(
        z_real, z, packed_params)

    D_loss_real = s1_real / n_real     # BCE(real logits, ones)
    D_loss_fake = s0_fake / n_fake     # BCE(fake logits, zeros)
    D_loss = 0.5 * (D_loss_real + D_loss_fake)
    if not with_G:
        return D_loss
    G_loss = s1_fake / n_fake          # BCE(fake logits, ones)
    return D_loss, G_loss


def _linear_params(key, fan_in, fan_out):
    """Deterministic torch.nn.Linear-style init: U(-1/sqrt(fan_in), 1/sqrt(fan_in))."""
    kw, kb = jax.random.split(key)
    bound = 1.0 / math.sqrt(fan_in)
    w = jax.random.uniform(kw, (fan_in, fan_out), jnp.float32, -bound, bound)
    b = jax.random.uniform(kb, (1, fan_out), jnp.float32, -bound, bound)
    return w, b


def _ref_forward(z_fake, z_real, params_real, params_fake):
    """Pure-JAX reference (matching the kernel's bf16 matmul precision)."""
    def disc(x, p):
        w1, b1, w2, b2, w3, b3 = p
        h1 = jnp.dot(x.astype(jnp.bfloat16), w1.astype(jnp.bfloat16),
                     preferred_element_type=jnp.float32) + b1
        h1 = jnp.maximum(h1, NEG_SLOPE * h1)
        h2 = jnp.dot(h1.astype(jnp.bfloat16), w2.astype(jnp.bfloat16),
                     preferred_element_type=jnp.float32) + b2
        h2 = jnp.maximum(h2, NEG_SLOPE * h2)
        return jnp.sum(h2 * w3.T, axis=-1, keepdims=True) + b3

    lr = disc(z_real, params_real)
    lf = disc(z_fake, params_fake)
    sp = jax.nn.softplus
    D_loss_real = jnp.mean(sp(-lr))
    D_loss_fake = jnp.mean(sp(lf))
    G_loss = jnp.mean(sp(-lf))
    return 0.5 * (D_loss_real + D_loss_fake), G_loss


if __name__ == "__main__":
    # Small shapes consistent with the module's forward:
    #   z (fake samples)       : [batch,    dim_z]
    #   z_real (drawn in fwd)  : [dim_data, dim_z]
    dim_z = 32
    dim_data = 8
    batch = 8
    n_hidden_d = 100   # non-multiple of 128 to exercise the hidden-dim padding
    n_output_d = 1

    key = jax.random.PRNGKey(0)
    keys = jax.random.split(key, 8)

    dr1_w, dr1_b = _linear_params(keys[0], dim_z, n_hidden_d)
    dr2_w, dr2_b = _linear_params(keys[1], n_hidden_d, n_hidden_d)
    dr3_w, dr3_b = _linear_params(keys[2], n_hidden_d, n_output_d)
    df1_w, df1_b = _linear_params(keys[3], dim_z, n_hidden_d)
    df2_w, df2_b = _linear_params(keys[4], n_hidden_d, n_hidden_d)
    df3_w, df3_b = _linear_params(keys[5], n_hidden_d, n_output_d)
    params_real = (dr1_w, dr1_b, dr2_w, dr2_b, dr3_w, dr3_b)
    params_fake = (df1_w, df1_b, df2_w, df2_b, df3_w, df3_b)

    z = jax.random.normal(keys[6], (batch, dim_z), jnp.float32)
    z_real = jax.random.normal(keys[7], (dim_data, dim_z), jnp.float32)

    # Hoisted one-time weight packing (stack + bf16 cast + hidden padding).
    packed = jax.block_until_ready(
        pack_discriminator_params(params_real, params_fake))

    forward = jax.jit(gan_forward, static_argnames=("with_G",))
    D_loss, G_loss = forward(z, z_real, packed, with_G=True)
    D_loss, G_loss = jax.block_until_ready((D_loss, G_loss))

    D_ref, G_ref = _ref_forward(z, z_real, params_real, params_fake)
    assert jnp.allclose(D_loss, D_ref, atol=2e-3, rtol=2e-3), (D_loss, D_ref)
    assert jnp.allclose(G_loss, G_ref, atol=2e-3, rtol=2e-3), (G_loss, G_ref)

    print("KERNEL_OK")
</pallas_src>

<mosaic_0001>
module attributes {stable_mosaic.version = 11 : i64} {
  func.func @_gan_disc_kernel(%arg0: i32, %arg1: memref<2xi32, #tpu.memory_space<smem>>, %arg2: memref<2xi32, #tpu.memory_space<smem>>, %arg3: memref<16x32xbf16, #tpu.memory_space<vmem>>, %arg4: memref<1x32x128xbf16, #tpu.memory_space<vmem>>, %arg5: memref<1x1x128xf32, #tpu.memory_space<vmem>>, %arg6: memref<1x128x128xbf16, #tpu.memory_space<vmem>>, %arg7: memref<1x1x128xf32, #tpu.memory_space<vmem>>, %arg8: memref<1x1x128xf32, #tpu.memory_space<vmem>>, %arg9: memref<1x1x1xf32, #tpu.memory_space<vmem>>, %arg10: memref<1x8x128xf32, #tpu.memory_space<vmem>>) attributes {dimension_semantics = [#tpu.dimension_semantics<parallel>], iteration_bounds = array<i64: 2>, scalar_prefetch = 2 : i64, scratch_operands = 0 : i64, tpu.core_type = #tpu.core_type<tc>, window_params = [{transform_indices = @transform_0, window_bounds = array<i64: 16, 32>}, {transform_indices = @transform_1, window_bounds = array<i64: 1, 32, 128>}, {transform_indices = @transform_2, window_bounds = array<i64: 1, 1, 128>}, {transform_indices = @transform_3, window_bounds = array<i64: 1, 128, 128>}, {transform_indices = @transform_4, window_bounds = array<i64: 1, 1, 128>}, {transform_indices = @transform_5, window_bounds = array<i64: 1, 1, 128>}, {transform_indices = @transform_6, window_bounds = array<i64: 1, 1, 1>}, {transform_indices = @transform_7, window_bounds = array<i64: 1, 8, 128>}]} {
    %c0 = arith.constant 0 : index
    %c0_0 = arith.constant 0 : index
    %0 = vector.load %arg3[%c0, %c0_0] : memref<16x32xbf16, #tpu.memory_space<vmem>>, vector<16x32xbf16>
    %c0_1 = arith.constant 0 : index
    %c0_2 = arith.constant 0 : index
    %c0_3 = arith.constant 0 : index
    %1 = vector.load %arg4[%c0_1, %c0_2, %c0_3] : memref<1x32x128xbf16, #tpu.memory_space<vmem>>, vector<1x32x128xbf16>
    %2 = vector.shape_cast %1 : vector<1x32x128xbf16> to vector<32x128xbf16>
    %cst = arith.constant dense<0.000000e+00> : vector<16x128xf32>
    %3 = tpu.matmul %0, %2, %cst {dimension_numbers = #tpu.dot_dimension_numbers<[1], [0], [0], [1], [0, 0, 1, 1], [], []>} : vector<16x32xbf16>, vector<32x128xbf16>, vector<16x128xf32> -> vector<16x128xf32>
    %c0_4 = arith.constant 0 : index
    %c0_5 = arith.constant 0 : index
    %c0_6 = arith.constant 0 : index
    %4 = vector.load %arg5[%c0_4, %c0_5, %c0_6] : memref<1x1x128xf32, #tpu.memory_space<vmem>>, vector<1x1x128xf32>
    %5 = vector.shape_cast %4 : vector<1x1x128xf32> to vector<1x128xf32>
    %6 = vector.broadcast %5 : vector<1x128xf32> to vector<16x128xf32>
    %7 = arith.addf %3, %6 : vector<16x128xf32>
    %cst_7 = arith.constant 0.00999999977 : f32
    %8 = vector.broadcast %cst_7 : f32 to vector<16x128xf32>
    %9 = arith.mulf %8, %7 : vector<16x128xf32>
    %10 = arith.maximumf %7, %9 : vector<16x128xf32>
    %11 = arith.truncf %10 : vector<16x128xf32> to vector<16x128xbf16>
    %c0_8 = arith.constant 0 : index
    %c0_9 = arith.constant 0 : index
    %c0_10 = arith.constant 0 : index
    %12 = vector.load %arg6[%c0_8, %c0_9, %c0_10] : memref<1x128x128xbf16, #tpu.memory_space<vmem>>, vector<1x128x128xbf16>
    %13 = vector.shape_cast %12 : vector<1x128x128xbf16> to vector<128x128xbf16>
    %cst_11 = arith.constant dense<0.000000e+00> : vector<16x128xf32>
    %14 = tpu.matmul %11, %13, %cst_11 {dimension_numbers = #tpu.dot_dimension_numbers<[1], [0], [0], [1], [0, 0, 1, 1], [], []>} : vector<16x128xbf16>, vector<128x128xbf16>, vector<16x128xf32> -> vector<16x128xf32>
    %c0_12 = arith.constant 0 : index
    %c0_13 = arith.constant 0 : index
    %c0_14 = arith.constant 0 : index
    %15 = vector.load %arg7[%c0_12, %c0_13, %c0_14] : memref<1x1x128xf32, #tpu.memory_space<vmem>>, vector<1x1x128xf32>
    %16 = vector.shape_cast %15 : vector<1x1x128xf32> to vector<1x128xf32>
    %17 = vector.broadcast %16 : vector<1x128xf32> to vector<16x128xf32>
    %18 = arith.addf %14, %17 : vector<16x128xf32>
    %cst_15 = arith.constant 0.00999999977 : f32
    %19 = vector.broadcast %cst_15 : f32 to vector<16x128xf32>
    %20 = arith.mulf %19, %18 : vector<16x128xf32>
    %21 = arith.maximumf %18, %20 : vector<16x128xf32>
    %c0_16 = arith.constant 0 : index
    %c0_17 = arith.constant 0 : index
    %c0_18 = arith.constant 0 : index
    %22 = vector.load %arg8[%c0_16, %c0_17, %c0_18] : memref<1x1x128xf32, #tpu.memory_space<vmem>>, vector<1x1x128xf32>
    %23 = vector.shape_cast %22 : vector<1x1x128xf32> to vector<1x128xf32>
    %24 = vector.broadcast %23 : vector<1x128xf32> to vector<16x128xf32>
    %25 = arith.mulf %21, %24 : vector<16x128xf32>
    %cst_19 = arith.constant dense<0.000000e+00> : vector<16xf32>
    %26 = vector.multi_reduction <add>, %25, %cst_19 [1] : vector<16x128xf32> to vector<16xf32>
    %27 = vector.shape_cast %26 : vector<16xf32> to vector<16x1xf32>
    %c0_20 = arith.constant 0 : index
    %c0_21 = arith.constant 0 : index
    %c0_22 = arith.constant 0 : index
    %28 = vector.load %arg9[%c0_20, %c0_21, %c0_22] : memref<1x1x1xf32, #tpu.memory_space<vmem>>, vector<1x1x1xf32>
    %29 = vector.shape_cast %28 : vector<1x1x1xf32> to vector<1x1xf32>
    %30 = vector.broadcast %29 : vector<1x1xf32> to vector<16x1xf32>
    %31 = arith.addf %27, %30 : vector<16x1xf32>
    %32 = arith.index_cast %arg0 : i32 to index
    %33 = memref.load %arg2[%32] : memref<2xi32, #tpu.memory_space<smem>>
    %34 = tpu.iota {dimensions = array<i32: 0>} : vector<16x1xi32>
    %35 = vector.broadcast %33 : i32 to vector<16x1xi32>
    %36 = arith.cmpi slt, %34, %35 : vector<16x1xi32>
    %cst_23 = arith.constant 0.000000e+00 : f32
    %37 = vector.broadcast %cst_23 : f32 to vector<16x1xf32>
    %38 = arith.maximumf %31, %37 : vector<16x1xf32>
    %39 = math.absf %31 : vector<16x1xf32>
    %cst_24 = arith.constant 0.000000e+00 : f32
    %40 = vector.broadcast %cst_24 : f32 to vector<16x1xf32>
    %41 = arith.subf %40, %39 : vector<16x1xf32>
    %42 = math.exp %41 : vector<16x1xf32>
    %43 = math.log1p %42 : vector<16x1xf32>
    %44 = arith.addf %38, %43 : vector<16x1xf32>
    %cst_25 = arith.constant 0.000000e+00 : f32
    %45 = vector.broadcast %cst_25 : f32 to vector<16x1xf32>
    %46 = arith.select %36, %44, %45 : vector<16x1xi1>, vector<16x1xf32>
    %cst_26 = arith.constant 0.000000e+00 : f32
    %47 = vector.broadcast %cst_26 : f32 to vector<16x1xf32>
    %48 = arith.select %36, %31, %47 : vector<16x1xi1>, vector<16x1xf32>
    %49 = vector.shape_cast %46 : vector<16x1xf32> to vector<1x16x1xf32>
    %cst_27 = arith.constant dense<0.000000e+00> : vector<1xf32>
    %50 = vector.multi_reduction <add>, %49, %cst_27 [1, 2] : vector<1x16x1xf32> to vector<1xf32>
    %51 = vector.shape_cast %50 : vector<1xf32> to vector<1x1x1xf32>
    %52 = vector.extract %51[0, 0, 0] : f32 from vector<1x1x1xf32>
    %53 = vector.shape_cast %48 : vector<16x1xf32> to vector<1x16x1xf32>
    %cst_28 = arith.constant dense<0.000000e+00> : vector<1xf32>
    %54 = vector.multi_reduction <add>, %53, %cst_28 [1, 2] : vector<1x16x1xf32> to vector<1xf32>
    %55 = vector.shape_cast %54 : vector<1xf32> to vector<1x1x1xf32>
    %56 = vector.extract %55[0, 0, 0] : f32 from vector<1x1x1xf32>
    %57 = arith.subf %52, %56 : f32
    %58 = tpu.iota {dimensions = array<i32: 0>} : vector<8x128xi32>
    %c0_i32 = arith.constant 0 : i32
    %59 = vector.broadcast %c0_i32 : i32 to vector<8x128xi32>
    %60 = arith.cmpi eq, %58, %59 : vector<8x128xi32>
    %c1_i32 = arith.constant 1 : i32
    %61 = vector.broadcast %c1_i32 : i32 to vector<8x128xi32>
    %62 = arith.cmpi eq, %58, %61 : vector<8x128xi32>
    %cst_29 = arith.constant 0.000000e+00 : f32
    %63 = vector.broadcast %57 : f32 to vector<8x128xf32>
    %64 = vector.broadcast %cst_29 : f32 to vector<8x128xf32>
    %65 = arith.select %62, %63, %64 : vector<8x128xi1>, vector<8x128xf32>
    %66 = vector.broadcast %52 : f32 to vector<8x128xf32>
    %67 = arith.select %60, %66, %65 : vector<8x128xi1>, vector<8x128xf32>
    %c0_30 = arith.constant 0 : index
    %c0_31 = arith.constant 0 : index
    %c0_32 = arith.constant 0 : index
    %68 = vector.load %arg10[%c0_30, %c0_31, %c0_32] : memref<1x8x128xf32, #tpu.memory_space<vmem>>, vector<1x8x128xf32>
    %69 = vector.shape_cast %68 : vector<1x8x128xf32> to vector<8x128xf32>
    %70 = vector.shape_cast %67 : vector<8x128xf32> to vector<1x8x128xf32>
    tpu.vector_store %arg10[%c0_30, %c0_31, %c0_32], %70 {strides = array<i32>} : memref<1x8x128xf32, #tpu.memory_space<vmem>>, vector<1x8x128xf32>,
    return
  }
  func.func @transform_0(%arg0: i32, %arg1: memref<2xi32, #tpu.memory_space<smem>>, %arg2: memref<2xi32, #tpu.memory_space<smem>>) -> (i32, i32) {
    %c0_i32 = arith.constant 0 : i32
    %c0_i32_0 = arith.constant 0 : i32
    return %arg0, %c0_i32 : i32, i32
  }
  func.func @transform_1(%arg0: i32, %arg1: memref<2xi32, #tpu.memory_space<smem>>, %arg2: memref<2xi32, #tpu.memory_space<smem>>) -> (i32, i32, i32) {
    %0 = arith.index_cast %arg0 : i32 to index
    %1 = memref.load %arg1[%0] : memref<2xi32, #tpu.memory_space<smem>>
    %c0_i32 = arith.constant 0 : i32
    %c0_i32_0 = arith.constant 0 : i32
    %c0_i32_1 = arith.constant 0 : i32
    return %1, %c0_i32, %c0_i32_0 : i32, i32, i32
  }
  func.func @transform_2(%arg0: i32, %arg1: memref<2xi32, #tpu.memory_space<smem>>, %arg2: memref<2xi32, #tpu.memory_space<smem>>) -> (i32, i32, i32) {
    %0 = arith.index_cast %arg0 : i32 to index
    %1 = memref.load %arg1[%0] : memref<2xi32, #tpu.memory_space<smem>>
    %c0_i32 = arith.constant 0 : i32
    %c0_i32_0 = arith.constant 0 : i32
    %c0_i32_1 = arith.constant 0 : i32
    return %1, %c0_i32, %c0_i32_0 : i32, i32, i32
  }
  func.func @transform_3(%arg0: i32, %arg1: memref<2xi32, #tpu.memory_space<smem>>, %arg2: memref<2xi32, #tpu.memory_space<smem>>) -> (i32, i32, i32) {
    %0 = arith.index_cast %arg0 : i32 to index
    %1 = memref.load %arg1[%0] : memref<2xi32, #tpu.memory_space<smem>>
    %c0_i32 = arith.constant 0 : i32
    %c0_i32_0 = arith.constant 0 : i32
    %c0_i32_1 = arith.constant 0 : i32
    return %1, %c0_i32, %c0_i32_0 : i32, i32, i32
  }
  func.func @transform_4(%arg0: i32, %arg1: memref<2xi32, #tpu.memory_space<smem>>, %arg2: memref<2xi32, #tpu.memory_space<smem>>) -> (i32, i32, i32) {
    %0 = arith.index_cast %arg0 : i32 to index
    %1 = memref.load %arg1[%0] : memref<2xi32, #tpu.memory_space<smem>>
    %c0_i32 = arith.constant 0 : i32
    %c0_i32_0 = arith.constant 0 : i32
    %c0_i32_1 = arith.constant 0 : i32
    return %1, %c0_i32, %c0_i32_0 : i32, i32, i32
  }
  func.func @transform_5(%arg0: i32, %arg1: memref<2xi32, #tpu.memory_space<smem>>, %arg2: memref<2xi32, #tpu.memory_space<smem>>) -> (i32, i32, i32) {
    %0 = arith.index_cast %arg0 : i32 to index
    %1 = memref.load %arg1[%0] : memref<2xi32, #tpu.memory_space<smem>>
    %c0_i32 = arith.constant 0 : i32
    %c0_i32_0 = arith.constant 0 : i32
    %c0_i32_1 = arith.constant 0 : i32
    return %1, %c0_i32, %c0_i32_0 : i32, i32, i32
  }
  func.func @transform_6(%arg0: i32, %arg1: memref<2xi32, #tpu.memory_space<smem>>, %arg2: memref<2xi32, #tpu.memory_space<smem>>) -> (i32, i32, i32) {
    %0 = arith.index_cast %arg0 : i32 to index
    %1 = memref.load %arg1[%0] : memref<2xi32, #tpu.memory_space<smem>>
    %c0_i32 = arith.constant 0 : i32
    %c0_i32_0 = arith.constant 0 : i32
    %c0_i32_1 = arith.constant 0 : i32
    return %1, %c0_i32, %c0_i32_0 : i32, i32, i32
  }
  func.func @transform_7(%arg0: i32, %arg1: memref<2xi32, #tpu.memory_space<smem>>, %arg2: memref<2xi32, #tpu.memory_space<smem>>) -> (i32, i32, i32) {
    %c0_i32 = arith.constant 0 : i32
    %c0_i32_0 = arith.constant 0 : i32
    %c0_i32_1 = arith.constant 0 : i32
    return %arg0, %c0_i32, %c0_i32_0 : i32, i32, i32
  }
}

</mosaic_0001>

<bundles_post_ra>
// kernel: gan_forward.1
= control target key start
LH: loop header
LB: loop body
LE: loop exit
PB: predicated region body
PF: predicated region fallthrough
CT: control target
= control target key end

     0   :  { %s1307_s0 = inlined_call_operand.vmem [shape: s32[2], index: 0, kind: input, shape index: {}]   ;;  %s1308_s2 = inlined_call_operand.vmem [shape: bf16[32,32], index: 2, kind: input, shape index: {}]   ;;  %s1309_s3 = inlined_call_operand.vmem [shape: bf16[2,32,128], index: 3, kind: input, shape index: {}]   ;;  %s1310_s4 = inlined_call_operand.vmem [shape: f32[2,1,128], index: 4, kind: input, shape index: {}]   ;;  %s1311_s5 = inlined_call_operand.hbm [shape: bf16[2,128,128], index: 5, kind: input, shape index: {}]   ;;  %s1312_s6 = inlined_call_operand.vmem [shape: f32[2,1,128], index: 6, kind: input, shape index: {}]   ;;  %s1313_s7 = inlined_call_operand.vmem [shape: f32[2,1,128], index: 7, kind: input, shape index: {}]   ;;  %s1314_s8 = inlined_call_operand.vmem [shape: f32[2,1,1], index: 8, kind: input, shape index: {}]   ;;  %s1315_s9 = inlined_call_operand.vmem [shape: f32[2,8,128], index: 9, kind: output, shape index: {}]   ;;  %s1316_s1 = inlined_call_operand.vmem [shape: s32[2], index: 1, kind: input, shape index: {}]  }
   0x1   :  { %s14_s11 = sshll.u32 %s1307_s0, 4  ;;  %s18_s14 = sshll.u32 %s1316_s1, 4  ;;  %s15_s11 = int_to_ptr.vmem [resolvable:$true] %s14_s11  ;;  %s19_s14 = int_to_ptr.vmem [resolvable:$true] %s18_s14 }
   0x2   :  { %s1009_s15 = scalar_lea.vmem %s15_s11, 16  ;;  %p1014_p1 = scmp.lt.s32.totalorder %s15_s11, %s15_s11 }
   0x3   :  { %p1010_p0 = scmp.ne.s32.totalorder %s15_s11, %s1009_s15  ;;  %p1015_p2 = scmp.lt.s32.totalorder %s1009_s15, %s1009_s15 }
   0x5   :  { %p1016_p3 = por %p1015_p2, %p1014_p1 }
   0x7   :  { %p1017_p4 = pnand %p1016_p3, %p1010_p0 }
   0x9   :  { %1020 = shalt.err (!%p1017_p4)  }
   0xa   :  { %s1101_s16 = smov [#allocation3]   ;;  %s1021_s17 = scalar_lea.vmem %s19_s14, 16 }
   0xb   :  { %17 = dma.vmem_to_smem %s15_s11, 16, %s1101_s16, [#allocation2] }
   0xc   :  { %p1022_p5 = scmp.ne.s32.totalorder %s19_s14, %s1021_s17  ;;  %p1026_p6 = scmp.lt.s32.totalorder %s19_s14, %s19_s14 }
   0xd   :  { %p1027_p7 = scmp.lt.s32.totalorder %s1021_s17, %s1021_s17 }
   0xf   :  { %p1028_p8 = por %p1027_p7, %p1026_p6 }
  0x11   :  { %p1029_p9 = pnand %p1028_p8, %p1022_p5 }
  0x13   :  { %1032 = shalt.err (!%p1029_p9)  }
  0x14   :  { %s1102_s0 = smov [#allocation4]  }
  0x15   :  { %21 = dma.vmem_to_smem %s19_s14, 16, %s1102_s0, [#allocation2] }
  0x16   :  { %1079 = dma.done.wait [#allocation2], 32 }
  0x17   :  { %1080 = vsyncadd [#allocation2], 4294967264 }
  0x18   :  { %23 = sfence }
  0x19   :  { %24 = vsyncpa [#allocation6], 0 }
  0x1a   :  { %26 = vsyncpa [#allocation6 + $0x1], 0  ;;  %s1164_s1 = smov 0   ;;  %s1166_s18 = smov 0  }
  0x1b   :  { %s1168_s19 = smov 0   ;;  %s1170_s20 = smov 0  }
  0x1c LB: > { %s1180_s21 = sadd.s32 4294967295, %s1099_s20   ;;  %s1182_s22 = sadd.s32 1, %s1099_s20   ;;  %s1099_s20 = sphi %s1170_s20, %s1325_s20   ;;  %s1095_s19 = sphi %s1168_s19, %s1324_s19   ;;  %s1091_s18 = sphi %s1166_s18, %s1323_s18   ;;  %s1087_s1 = sphi %s1164_s1, %s1322_s1  }
  0x1d   : > { %s118_s23 = sld [smem:[#allocation3 + %s1099_s20]]  ;;  %p130_p10 = scmp.ne.s32.totalorder %s1095_s19, %s1091_s18 }
  0x1e   : > { %s119_s24 = sld [smem:[#allocation3 + %s1182_s22]]  ;;  %p131_p11 = scmp.eq.s32.totalorder %s1099_s20, 0 }
  0x1f   : > { %p136_p12 = scmp.ne.s32.totalorder %s1091_s18, %s1087_s1  ;;  %p137_p13 = scmp.eq.s32.totalorder %s1180_s21, 0 }
  0x20   : > { %s123_s25 = sadd.s32 1, %s1095_s19  ;;  %p132_p0 = por %p131_p11, %p130_p10 }
  0x21   : > { %p1190_p1 = por %p137_p13, %p136_p12  ;;  %s297_s27 = sand.u32 1, %s1095_s19  }
  0x22   : > { %p951_p2 = scmp.lt.s32.totalorder %s1099_s20, 2  ;;  %s867_s29 = sshll.u32 %s297_s27, 6 }
  0x23   : > { %s1318_s26 = scalar_select %p1190_p1, 1, 0 }
  0x24   : > { %s120_s28 = ssub.s32 %s118_s23, %s119_s24  ;;  %p1195_p4 = pnand %p951_p2, %p132_p0 }
  0x25   : > { %p121_p3 = scmp.eq.s32.totalorder %s120_s28, 0  ;;  %s301_s14 = scalar_lea.vmem [#allocation5], %s867_s29 }
  0x26   : > { %s941_s11 = scalar_select %p132_p0, [#allocation3], [#allocation7] }
  0x27   : > { %s1200_s10 = scalar_select %p121_p3, %s1095_s19, %s123_s25  }
  0x28   : > { %s942_s12 = scalar_select %p132_p0, %s1099_s20, 0 }
  0x29   : > { %s1327_s11 = smov (!%p951_p2, %s941_s11), [#allocation8]  ;;  %s309_s15 = sshll.u32 %s301_s14, 4  ;;  %s1202_s15 = int_to_ptr.vmem [resolvable:$true] %s309_s15 }
  0x2a   : > { %s1329_s12 = smov (!%p951_p2, %s942_s12), 0  ;;  %p870_p5 = scmp.ge.s32.totalorder %s1099_s20, 1 }
  0x2b   : > { %s302_s13 = sld [smem:[%s1327_s11 + %s1329_s12]]  ;;  %p341_p6 = scmp.lt.s32.totalorder %s1099_s20, 3 }
  0x2c   : > { %s1213_s24 = scalar_lea.sflag [#allocation6], %s297_s27  ;;  %p1035_p9 = pneg %p1195_p4 }
  0x2d   : > { %p1204_p7 = pnand %p870_p5, %p341_p6  ;;  %s1038_s29 = scalar_lea.hbm %s1311_s5, 2048 }
  0x31   : > { %s895_s17 = sshll.u32 %s302_s13, 10 }
  0x32   : > { %s1211_s23 = scalar_lea.hbm %s1311_s5, %s895_s17 }
  0x33   : > { %s1033_s25 = scalar_lea.hbm %s1211_s23, 1024  ;;  %p1039_p12 = scmp.lt.u32.totalorder %s1211_s23, %s1311_s5 }
  0x34   : > { %p1034_p8 = scmp.ne.s32.totalorder %s1211_s23, %s1033_s25  ;;  %p1040_p13 = scmp.lt.u32.totalorder %s1038_s29, %s1033_s25 }
  0x35   : > { %p1042_p2 = scmp.lt.u32.totalorder %s1033_s25, %s1211_s23 }
  0x36   : > { %p1036_p10 = pnand %p1035_p9, %p1034_p8  ;;  %p1041_p0 = por %p1040_p13, %p1039_p12 }
  0x38   : > { %p1037_p11 = pneg %p1036_p10  ;;  %p1043_p3 = por %p1042_p2, %p1041_p0 }
  0x3a   : > { %p1044_p5 = pnand %p1043_p3, %p1037_p11 }
  0x3c   : > { %1047 = shalt.err (!%p1044_p5)
}
  0x3d   : > { %s1048_s27 = scalar_lea.vmem %s1202_s15, 1024  ;;  %s1103_s13 = smov [#allocation5]  }
  0x3e   : > { %p1049_p6 = scmp.ne.s32.totalorder %s1202_s15, %s1048_s27  ;;  %s1053_s14 = sshll.u32 %s1103_s13, 4  ;;  %s1054_s14 = int_to_ptr.vmem [resolvable:$false] %s1053_s14 }
  0x3f   : > { %s1055_s17 = scalar_lea.vmem %s1054_s14, 2048  ;;  %p1056_p1 = scmp.lt.s32.totalorder %s1202_s15, %s1054_s14 }
  0x40   : > { %p1051_p8 = pnand %p1049_p6, %p1035_p9  ;;  %p1057_p12 = scmp.lt.s32.totalorder %s1055_s17, %s1048_s27 }
  0x42   : > { %p1052_p10 = pneg %p1051_p8  ;;  %p1058_p13 = por %p1057_p12, %p1056_p1 }
  0x44   : > { %p1059_p0 = pnand %p1058_p13, %p1052_p10 }
  0x46   : > { %1062 = shalt.err (!%p1059_p0)
}
  0x47   : > { %s1104_s0 = smov 64   ;;  %s1105_s1 = smov 4  }
  0x48   : > { %950 = dma.hbm_to_vmem [thread:$0]  (!%p1195_p4), %s1211_s23, 1024, %s1202_s15, %s1213_s24, %s1104_s0, %s1104_s0, %s1105_s1  }
  0x49   : > { %345 = sbr.rel (%p1204_p7) target bundleno = 943 (0x3af), region = 48  ;;  %s347_s25 = sand.u32 (!%p1204_p7), 1, %s1091_s18  }
  0x4a   : > { %s871_s20 = sshll.u32 (!%p1204_p7), %s347_s25, 6  ;;  %s348_s28 = scalar_lea.sflag (!%p1204_p7), [#allocation6], %s347_s25 }
  0x4b   : > { %s1244_s29 = scalar_lea.vmem (!%p1204_p7), [#allocation5], %s871_s20  ;;  %p1321_p1 = scmp.ne.s32.totalorder (!%p1204_p7), %s1318_s26, 0 }
  0x50   : > { %1082 = dma.done.wait (%p1321_p1), %s348_s28, 1024  }
  0x51   : > { %1084 = vsyncadd (%p1321_p1), %s348_s28, 4294966272  ;;  %s872_s30 = sshll.u32 %s1180_s21, 1  ;;  %v1106_v0 = vmov 0.0   ;;  %s414_s15 = sld [smem:[#allocation3 + %s1180_s21]]  ;;  %vm1107_vm0 = vmmov 0   ;;  %v993_v1 = vld [vmem:[%s1244_s29] sm:$0xff]   ;;  %v666_v54 = vlaneseq }
  0x52   : > { %909 = vmatprep.subr.bf16.mxu0 %v1106_v0  ;;  %913 = vmatprep.mubr.msk.bf16.mxu0 %vm1107_vm0, %v1106_v0  ;;  %p409_p4 = scmp.lt.s32.totalorder %s872_s30, 3  ;;  %v994_v2 = vld [vmem:[%s1244_s29 + $0x8] sm:$0xff]   ;;  %v995_v4 = vld [vmem:[%s1244_s29 + $0x10] sm:$0xff]   ;;  %v996_v7 = vld [vmem:[%s1244_s29 + $0x18] sm:$0xff]   ;;  %vm477_vm1 = vcmask 261120   ;;  %s421_s14 = sld [smem:[#allocation3 + %s1180_s21]] }
  0x53   : > { %917 = vmatprep.subr.bf16.mxu1 %v1106_v0  ;;  %933 = vmatprep.mubr.msk.bf16.mxu1 %vm1107_vm0, %v1106_v0  ;;  %v997_v8 = vld [vmem:[%s1244_s29 + $0x20] sm:$0xff]   ;;  %v998_v9 = vld [vmem:[%s1244_s29 + $0x28] sm:$0xff]   ;;  %v999_v10 = vld [vmem:[%s1244_s29 + $0x30] sm:$0xff]   ;;  %s427_s25 = sld [smem:[#allocation3 + %s1180_s21]]  ;;  %v1283_v59 = vshrl.u32 %v666_v54, 7  ;;  %vm706_vm6 = vcmask 7168  }
  0x54   : > { %s1331_s30 = smov (!%p409_p4, %s872_s30), 3  ;;  %918 = vmatpush3.bf16.msra.mxu1 %v993_v1  ;;  %v1000_v11 = vld [vmem:[%s1244_s29 + $0x38] sm:$0xff]   ;;  %s432_s20 = sld [smem:[#allocation3 + %s1180_s21]] }
  0x55   : > { %s873_s16 = sshll.u32 %s1331_s30, 2  ;;  %919 = vmatprep.subr.bf16.mxu1 %v1106_v0  ;;  %s437_s24 = sld [smem:[#allocation3 + %s1180_s21]]  ;;  %v668_v1 = vadd.s32 8, %v1283_v59  ;;  %vm733_vm7 = vcmp.eq.s32.totalorder %v1283_v59, 1  ;;  %vm732_vm8 = vcmp.eq.s32.totalorder %v1283_v59, 0 }
  0x56   : > { %s412_s26 = scalar_lea.vmem %s1308_s2, %s873_s16  ;;  %s665_s27 = sld [smem:[#allocation4 + %s1180_s21]] }
  0x57   : > { %p415_p7 = scmp.lt.s32.totalorder %s414_s15, 1  ;;  %v992_v6 = vld [vmem:[%s412_s26] sm:$0xff]   ;;  %p442_p5 = scmp.lt.s32.totalorder %s1180_s21, 1 }
  0x58   : > { %920 = vmatpush3.bf16.msra.mxu1 %v994_v2  ;;  %p422_p9 = scmp.lt.s32.totalorder %s421_s14, 1 }
  0x59   : > { %s1333_s15 = smov (!%p415_p7, %s414_s15), 1  ;;  %921 = vmatprep.subr.bf16.mxu1 %v1106_v0  ;;  %p428_p11 = scmp.lt.s32.totalorder %s427_s25, 1 }
  0x5a   : > { %s896_s11 = sshll.u32 %s1333_s15, 4  ;;  %s1335_s14 = smov (!%p422_p9, %s421_s14), 1 }
  0x5b   : > { %s419_s13 = scalar_lea.vmem %s1309_s3, %s896_s11  ;;  %s424_s1 = scalar_lea.vmem %s1310_s4, %s1335_s14 }
  0x5c   : > { %v990_v3 = vld [vmem:[%s419_s13] sm:$0xff]   ;;  %v991_v5 = vld [vmem:[%s419_s13 + $0x8] sm:$0xff]   ;;  %922 = vmatpush3.bf16.msra.mxu1 %v995_v4  ;;  %s1337_s25 = smov (!%p428_p11, %s427_s25), 1  ;;  %p433_p2 = scmp.lt.s32.totalorder %s432_s20, 1  ;;  %v669_v4 = vstv %s665_s27 }
  0x5d   : > { %910 = vmatpush3.bf16.msra.mxu0 %v990_v3  ;;  %923 = vmatprep.subr.bf16.mxu1 %v1106_v0  ;;  %v877_v12 = vld [vmem:[%s424_s1] ss:$0 sm:$0xff]  ;;  %s430_s30 = scalar_lea.vmem %s1312_s6, %s1337_s25  ;;  %p438_p3 = scmp.lt.s32.totalorder %s437_s24, 1  ;;  %vm670_vm4 = vcmp.lt.s32.totalorder %v1283_v59, %v669_v4  ;;  %vm671_vm5 = vcmp.lt.s32.totalorder %v668_v1, %v669_v4 }
  0x5e   : > { %911 = vmatprep.subr.bf16.mxu0 %v1106_v0  ;;  %s1339_s20 = smov (!%p433_p2, %s432_s20), 1  ;;  %v882_v24 = vld [vmem:[%s430_s30] ss:$0 sm:$0xff]  ;;  %s1343_s21 = smov (!%p442_p5, %s1180_s21), 1 }
  0x5f   : > { %s435_s23 = scalar_lea.vmem %s1313_s7, %s1339_s20  ;;  %s1341_s24 = smov (!%p438_p3, %s437_s24), 1 }
  0x60   : > { %924 = vmatpush3.bf16.msra.mxu1 %v996_v7  ;;  %v891_v32 = vld [vmem:[%s435_s23] ss:$0 sm:$0xff]  ;;  %s440_s12 = scalar_lea.vmem %s1314_s8, %s1341_s24  ;;  %s876_s14 = sshll.u32 %s1343_s21, 3 }
  0x61   : > { %912 = vmatpush3.bf16.msra.mxu0 %v991_v5  ;;  %925 = vmatprep.subr.bf16.mxu1 %v1106_v0  ;;  %v892_v38 = vld [vmem:[%s440_s12] ss:$0 sm:$0xff]  ;;  %s445_s20 = scalar_lea.vmem %s1315_s9, %s876_s14 }
  0x64   : > { %914 = vmatmul.mubr.msk.bf16.vlgmr.msra.gmra.mrb[0].mxu0 %vm477_vm1, %v992_v6  ;;  %926 = vmatpush3.bf16.msra.mxu1 %v997_v8 }
  0x65   : > { %927 = vmatprep.subr.bf16.mxu1 %v1106_v0 }
  0x68   : > { %928 = vmatpush3.bf16.msra.mxu1 %v998_v9 }
  0x69   : > { %929 = vmatprep.subr.bf16.mxu1 %v1106_v0 }
  0x6c   : > { %930 = vmatpush3.bf16.msra.mxu1 %v999_v10 }
  0x6d   : > { %931 = vmatprep.subr.bf16.mxu1 %v1106_v0 }
  0x70   : > { %932 = vmatpush3.bf16.msra.mxu1 %v1000_v11 }
 0x137   : > { %v515_v13 = vpop.f32.mrb[0].mxu0 }
 0x138   : > { %v516_v14 = vadd.f32 %v877_v12, %v515_v13  ;;  %v915_v15 = vpop.f32.mrb[1].mxu0 }
 0x139   : > { %v518_v16 = vpop.f32.mrb[2].mxu0 }
 0x13a   : > { %v522_v17 = vmul.f32 0.01, %v516_v14  ;;  %v519_v18 = vadd.f32 %v877_v12, %v518_v16  ;;  %v916_v19 = vpop.f32.mrb[3].mxu0 }
 0x13c   : > { %v523_v20 = vmul.f32 0.01, %v519_v18  ;;  %v524_v21 = vmax.f32 %v516_v14, %v522_v17 }
 0x13e   : > { %v525_v22 = vmax.f32 %v519_v18, %v523_v20 }
 0x140   : > { %v526_v23 = vpack.c.bf16 %v525_v22, %v524_v21 }
 0x142   : > { %934 = vmatmul.mubr.bf16.vlgmr.msra.gmra.mrb[0].mxu1 %v526_v23 }
 0x215   : > { %v632_v25 = vpop.f32.mrb[0].mxu1 }
 0x216   : > { %v633_v26 = vadd.f32 %v882_v24, %v632_v25  ;;  %v935_v27 = vpop.f32.mrb[1].mxu1 }
 0x217   : > { %v635_v28 = vpop.f32.mrb[2].mxu1 }
 0x218   : > { %v639_v29 = vmul.f32 0.01, %v633_v26  ;;  %v636_v30 = vadd.f32 %v882_v24, %v635_v28  ;;  %v936_v31 = vpop.f32.mrb[3].mxu1 }
 0x21a   : > { %v640_v33 = vmul.f32 0.01, %v636_v30  ;;  %v641_v34 = vmax.f32 %v633_v26, %v639_v29 }
 0x21c   : > { %v642_v35 = vmax.f32 %v636_v30, %v640_v33  ;;  %v650_v36 = vmul.f32 %v891_v32, %v641_v34 }
 0x21e   : > { %652 = vadd.xlane.f32.xlu0 %v650_v36  ;;  %v651_v37 = vmul.f32 %v891_v32, %v642_v35 }
 0x222   : > { %654 = vadd.xlane.f32.xlu0 %v651_v37 }
 0x2ab   : > { %v653_v39 = vpop.xlane.xlu0 %652 }
 0x2ac   : > { %v663_v40 = vadd.f32 %v892_v38, %v653_v39 }
 0x2ae   : > { %v674_v41 = vand.u32 2147483647, %v663_v40  ;;  %v672_v63 = vmax.f32 %v663_v40, 0.0  ;;  %v704_v17 = vsel %vm670_vm4, %v663_v40, 0.0 }
 0x2af   : > { %v655_v42 = vpop.xlane.xlu0 %654  ;;  %v719_v19 = vsel %vm706_vm6, %v704_v17, 0.0 }
 0x2b0   : > { %v676_v43 = vsub.f32 0.0, %v674_v41  ;;  %v664_v44 = vadd.f32 %v892_v38, %v655_v42 }
 0x2b2   : > { %v678_v45 = vmul.f32 1.442695, %v676_v43  ;;  %v675_v46 = vand.u32 2147483647, %v664_v44  ;;  %v673_v8 = vmax.f32 %v664_v44, 0.0  ;;  %v705_v13 = vsel %vm671_vm5, %v664_v44, 0.0 }
 0x2b3   : > { %v720_v18 = vsel %vm706_vm6, %v705_v13, 0.0 }
 0x2b4   : > { %1001 = vpow2.f32 %v678_v45  ;;  %v677_v47 = vsub.f32 0.0, %v675_v46  ;;  %v721_v20 = vadd.f32 %v720_v18, %v719_v19 }
 0x2b6   : > { %v680_v48 = vmul.f32 1.442695, %v677_v47 }
 0x2b8   : > { %1003 = vpow2.f32 %v680_v48 }
 0x2be   : > { %v1002_v49 = vpop.eup %1001 }
 0x2bf   : > { %v682_v50 = vadd.f32 1.0, %v1002_v49  ;;  %v685_v53 = vmul.f32 -0.5, %v1002_v49  ;;  %v688_v57 = vand.u32 2147483647, %v1002_v49 }
 0x2c1   : > { %1005 = vlog2.f32 %v682_v50  ;;  %v686_v55 = vadd.f32 1.0, %v685_v53  ;;  %vm689_vm2 = vcmp.lt.f32.partialorder %v688_v57, 0.0004427343 }
 0x2c2   : > { %v1004_v51 = vpop.eup %1003 }
 0x2c3   : > { %v691_v52 = vadd.f32 1.0, %v1004_v51  ;;  %v694_v56 = vmul.f32 -0.5, %v1004_v51  ;;  %v687_v61 = vmul.f32 %v1002_v49, %v686_v55  ;;  %v697_v0 = vand.u32 2147483647, %v1004_v51 }
 0x2c5   : > { %1007 = vlog2.f32 %v691_v52  ;;  %v695_v62 = vadd.f32 1.0, %v694_v56  ;;  %vm698_vm3 = vcmp.lt.f32.partialorder %v697_v0, 0.0004427343 }
 0x2c7   : > { %v696_v7 = vmul.f32 %v1004_v51, %v695_v62 }
 0x2cb   : > { %v1006_v58 = vpop.eup %1005 }
 0x2cc   : > { %v684_v60 = vmul.f32 0.6931472, %v1006_v58 }
 0x2ce   : > { %v690_v2 = vsel %vm689_vm2, %v687_v61, %v684_v60 }
 0x2cf   : > { %v1008_v3 = vpop.eup %1007  ;;  %v700_v5 = vadd.f32 %v690_v2, %v672_v63 }
 0x2d0   : > { %v693_v6 = vmul.f32 0.6931472, %v1008_v3 }
 0x2d1   : > { %v702_v11 = vsel %vm670_vm4, %v700_v5, 0.0 }
 0x2d2   : > { %v699_v9 = vsel %vm698_vm3, %v696_v7, %v693_v6  ;;  %v707_v14 = vsel %vm706_vm6, %v702_v11, 0.0 }
 0x2d3   : > { %v701_v10 = vadd.f32 %v699_v9, %v673_v8 }
 0x2d5   : > { %v703_v12 = vsel %vm671_vm5, %v701_v10, 0.0 }
 0x2d6   : > { %v708_v15 = vsel %vm706_vm6, %v703_v12, 0.0 }
 0x2d7   : > { %v709_v16 = vadd.f32 %v708_v15, %v707_v14 }
 0x2d9   : > { %710 = vadd.xlane.f32.xlu1 %v709_v16 }
 0x2dd   : > { %722 = vadd.xlane.f32.xlu1 %v721_v20 }
 0x366   : > { %v711_v21 = vpop.xlane.xlu1 %710 }
 0x367   : > { %v712_v22 = vrot.slane %v711_v21, 4 }
 0x369   : > { %v713_v23 = vadd.f32 %v712_v22, %v711_v21 }
 0x36a   : > { %v723_v24 = vpop.xlane.xlu1 %722 }
 0x36b   : > { %v714_v25 = vrot.slane %v713_v23, 2  ;;  %v724_v26 = vrot.slane %v723_v24, 4 }
 0x36d   : > { %v725_v27 = vadd.f32 %v724_v26, %v723_v24  ;;  %v715_v28 = vadd.f32 %v714_v25, %v713_v23 }
 0x36f   : > { %v726_v29 = vrot.slane %v725_v27, 2  ;;  %v716_v30 = vrot.slane %v715_v28, 1 }
 0x371   : > { %v727_v31 = vadd.f32 %v726_v29, %v725_v27  ;;  %v717_v32 = vadd.f32 %v716_v30, %v715_v28 }
 0x373   : > { %937 = vpush %v717_v32  ;;  %v728_v33 = vrot.slane %v727_v31, 1 }
 0x375   : > { %v729_v34 = vadd.f32 %v728_v33, %v727_v31 }
 0x377   : > { %939 = vpush %v729_v34 }
 0x3a4   : > { %s938_s13 = spop %937 }
 0x3a5   : > { %v736_v36 = vstv %s938_s13 }
 0x3a8   : > { %s940_s17 = spop %939 }
 0x3a9   : > { %s731_s0 = ssub.f32 %s938_s13, %s940_s17 }
 0x3ab   : > { %v734_v35 = vstv %s731_s0 }
 0x3ac   : > { %v735_v37 = vsel %vm733_vm7, %v734_v35, 0.0 }
 0x3ad   : > { %v737_v38 = vsel %vm732_vm8, %v736_v36, %v735_v37 }
 0x3ae   : > { %738 = vst [vmem:[%s445_s20] sm:$0xff] %v737_v38 }
 0x3af PF: > { %p29_p6 = scmp.ge.s32.totalorder %s1182_s22, 4   ;;  %s1322_s1 = smov %s1091_s18 }
 0x3b0   : > { %s1323_s18 = smov %s1095_s19  ;;  %s1324_s19 = smov %s1200_s10 }
 0x3b1   : > { %s1325_s20 = smov %s1182_s22  ;;  %31 = sbr.rel (!%p29_p6) target bundleno = 28 (0x1c), region = 106 }
 0x3b8   :  { %758 = vsyncpa [#allocation6], 1 }
 0x3b9   :  { %760 = vsyncpa [#allocation6 + $0x1], 1 }

</bundles_post_ra>
